<compile_context>
chip_gen: v5e
topology: v5e:2x2
jax: 0.10.0
libtpu: 0.0.40
codegen_flags: <defaults>
</compile_context>

<pallas_src>
import numpy as np
import jax
import jax.numpy as jnp
from jax.experimental import pallas as pl
from jax.experimental.pallas import tpu as pltpu


# ----------------------------------------------------------------------------
# Hardware query (best-effort; conservative fallbacks so any chip compiles)
# ----------------------------------------------------------------------------
_HW = {}


def _hw():
    if not _HW:
        vmem = 64 * 1024 * 1024          # conservative default = v7x per-core VMEM
        cores = 1
        try:
            info = pltpu.get_tpu_info()
            vmem = int(getattr(info, "vmem_capacity_bytes", vmem))
        except Exception:
            pass
        try:
            kind = str(getattr(jax.devices()[0], "device_kind", "")).lower()
            if "v7" in kind or "tpu7" in kind:
                cores = 2                # 2 TensorCores per chip on v7x
        except Exception:
            pass
        _HW["vmem"] = vmem
        _HW["cores"] = cores
        # scoped VMEM requested from the compiler (headroom left for its own scratch)
        _HW["vmem_limit"] = int(min(int(vmem * 0.85), 100 * 1024 * 1024))
        # bytes we budget for our own double-buffered blocks when picking tiles
        _HW["tile_budget"] = int(min(int(vmem * 0.55), 64 * 1024 * 1024))
    return _HW


def _round_up(n, m):
    return ((n + m - 1) // m) * m


def _pick_tile(n_rows, bytes_per_row, min_blocks=1, max_rows=32768):
    """Largest multiple-of-8 row tile that fits the per-chip VMEM budget, optionally
    split so at least `min_blocks` grid steps exist (keeps both v7x TCs fed)."""
    budget = _hw()["tile_budget"]
    tm = budget // max(1, bytes_per_row)
    tm = max(8, min(max_rows, (tm // 8) * 8))
    if min_blocks > 1:
        tm = min(tm, _round_up(-(-n_rows // min_blocks), 8))
    tm = min(tm, _round_up(n_rows, 8))
    return max(8, int(tm))


# ----------------------------------------------------------------------------
# Pallas kernels
# ----------------------------------------------------------------------------
def _linear_bn_relu_kernel(x_ref, w_ref, shift_ref, o_ref):
    # x_ref: (TM, K) f32 streamed straight from HBM (bf16 cast rides a free VPU slot),
    # w_ref: (K, C_out) bf16 with BN scale pre-folded, shift_ref: (1, C_out) f32.
    z = jnp.dot(x_ref[...].astype(jnp.bfloat16), w_ref[...],
                preferred_element_type=jnp.float32)
    o_ref[...] = jnp.maximum(z + shift_ref[...], 0.0).astype(o_ref.dtype)


def _group_linear_bn_relu_max_kernel(xg_ref, w_ref, shift_ref, o_ref):
    # xg_ref: (nsample, TM, K_pad) bf16 — one (TM, K_pad) MXU matmul per neighbour slab.
    # MaxPool1d(nsample) is a pure-VPU jnp.maximum chain over slabs (no reshape / XLU).
    # BN shift + ReLU applied after the max: max_s relu(z_s+shift) == relu(max_s z_s+shift).
    nsample = xg_ref.shape[0]
    w = w_ref[...]
    z = jnp.dot(xg_ref[0], w, preferred_element_type=jnp.float32)
    for s in range(1, nsample):
        z = jnp.maximum(z, jnp.dot(xg_ref[s], w, preferred_element_type=jnp.float32))
    o_ref[...] = jnp.maximum(z + shift_ref[...], 0.0).astype(o_ref.dtype)


# ----------------------------------------------------------------------------
# Wrappers (pallas_call plumbing)
# ----------------------------------------------------------------------------
def linear_bn_relu(x, w_bf16, shift):
    """y = relu(x @ (W*scale) + shift); x streamed as-is (f32), bf16 output."""
    n, k = x.shape
    c_out = w_bf16.shape[1]
    itemsize = jnp.dtype(x.dtype).itemsize
    # 2 pipeline buffers x (x block + bf16 out block) + f32 epilogue intermediate.
    bytes_per_row = 2 * (k * itemsize + c_out * 2) + c_out * 4
    tm = _pick_tile(n, bytes_per_row, min_blocks=_hw()["cores"])
    return pl.pallas_call(
        _linear_bn_relu_kernel,
        out_shape=jax.ShapeDtypeStruct((n, c_out), jnp.bfloat16),
        grid=(pl.cdiv(n, tm),),
        in_specs=[
            pl.BlockSpec((tm, k), lambda i: (i, 0)),
            pl.BlockSpec((k, c_out), lambda i: (0, 0)),
            pl.BlockSpec((1, c_out), lambda i: (0, 0)),
        ],
        out_specs=pl.BlockSpec((tm, c_out), lambda i: (i, 0)),
        compiler_params=pltpu.CompilerParams(
            dimension_semantics=("parallel",),
            vmem_limit_bytes=_hw()["vmem_limit"],
        ),
    )(x, w_bf16, shift)


def group_linear_bn_relu_max(xg_bf16, w_bf16, shift):
    """xg: (nsample, m, K_pad) bf16 neighbour-major.
    Returns (m, C_out) bf16 = maxpool_nsample(relu(xg @ (W*scale) + shift))."""
    nsample, m, k_pad = xg_bf16.shape
    c_out = w_bf16.shape[1]
    bytes_per_row = 2 * (nsample * k_pad * 2 + c_out * 2) + 2 * c_out * 4
    tm = _pick_tile(m, bytes_per_row, min_blocks=_hw()["cores"])
    return pl.pallas_call(
        _group_linear_bn_relu_max_kernel,
        out_shape=jax.ShapeDtypeStruct((m, c_out), jnp.bfloat16),
        grid=(pl.cdiv(m, tm),),
        in_specs=[
            pl.BlockSpec((nsample, tm, k_pad), lambda i: (0, i, 0)),
            pl.BlockSpec((k_pad, c_out), lambda i: (0, 0)),
            pl.BlockSpec((1, c_out), lambda i: (0, 0)),
        ],
        out_specs=pl.BlockSpec((tm, c_out), lambda i: (i, 0)),
        compiler_params=pltpu.CompilerParams(
            dimension_semantics=("parallel",),
            vmem_limit_bytes=_hw()["vmem_limit"],
        ),
    )(xg_bf16, w_bf16, shift)


def _fold_weight(params, k_pad=None):
    """Fold eval-mode BN scale into W ((x@W)*s == x@(W*s)), optionally zero-pad K,
    cast to bf16. shift stays f32 (applied on the f32 accumulator)."""
    w = params["w"] * params["scale"]
    if k_pad is not None and k_pad != w.shape[0]:
        w = jnp.pad(w, ((0, k_pad - w.shape[0]), (0, 0)))
    return w.astype(jnp.bfloat16), params["shift"].astype(jnp.float32)


# ----------------------------------------------------------------------------
# Host-side glue: furthest point sampling + kNN query-and-group (index selection)
# TODO(synk): pointops.furthestsampling / queryandgroup are data-dependent gathers done
# host-side (numpy); move on-device (index table in SMEM via PrefetchScalarGridSpec
# feeding the same fused kernel) to eliminate the host roundtrip at production sizes.
# ----------------------------------------------------------------------------
def _fps(seg_p, n_sample):
    n = seg_p.shape[0]
    idx = np.zeros(n_sample, dtype=np.int64)
    dist = np.full(n, np.inf, dtype=np.float32)
    idx[0] = 0
    for i in range(1, n_sample):
        d = np.sum((seg_p - seg_p[idx[i - 1]]) ** 2, axis=1)
        dist = np.minimum(dist, d)
        idx[i] = int(np.argmax(dist))
    return idx


def _host_sample_and_group(p_np, x_np, o_np, stride, nsample, k_pad):
    """FPS per segment + kNN query-and-group (use_xyz=True).  Grouped features are built
    neighbour-major (nsample, m, K_pad) directly at the padded contraction width."""
    n_o = [int(o_np[0]) // stride]
    count = n_o[0]
    for i in range(1, o_np.shape[0]):
        count += (int(o_np[i]) - int(o_np[i - 1])) // stride
        n_o.append(count)
    n_o = np.array(n_o, dtype=np.int32)

    idx_all, start, nstart = [], 0, 0
    for i in range(o_np.shape[0]):
        end, nend = int(o_np[i]), int(n_o[i])
        idx_all.append(_fps(p_np[start:end], nend - nstart) + start)
        start, nstart = end, nend
    idx = np.concatenate(idx_all)
    n_p = p_np[idx]

    c_in = x_np.shape[1]
    k = 3 + c_in
    m = idx.shape[0]
    xg = np.zeros((nsample, m, k_pad), dtype=np.float32)
    start, nstart = 0, 0
    for i in range(o_np.shape[0]):
        end, nend = int(o_np[i]), int(n_o[i])
        seg_p, seg_x = p_np[start:end], x_np[start:end]
        for j in range(nstart, nend):
            d = np.sum((seg_p - n_p[j]) ** 2, axis=1)
            nn = np.argsort(d)[:nsample]
            xg[:, j, :3] = seg_p[nn] - n_p[j]
            xg[:, j, 3:k] = seg_x[nn]
        start, nstart = end, nend
    return n_p, n_o, xg


def transition_down_forward(p, x, o, params, stride, nsample):
    """Mirrors TransitionDown.forward([p, x, o]).  BatchNorm1d in inference mode."""
    if stride == 1:
        w_bf16, shift = _fold_weight(params)
        y = linear_bn_relu(x, w_bf16, shift)
        return [p, y, o]

    p_np = np.asarray(jax.device_get(p), dtype=np.float32)
    x_np = np.asarray(jax.device_get(x), dtype=np.float32)
    o_np = np.asarray(jax.device_get(o)).astype(np.int64)

    c_in = x_np.shape[1]
    k_pad = _round_up(3 + c_in, 16)          # bf16 sublane packing for the weight K dim
    n_p, n_o, xg = _host_sample_and_group(p_np, x_np, o_np, stride, nsample, k_pad)

    w_bf16, shift = _fold_weight(params, k_pad)
    xg_dev = jnp.asarray(xg, dtype=jnp.bfloat16)     # single transfer, bf16

    y = group_linear_bn_relu_max(xg_dev, w_bf16, shift)
    return [jnp.asarray(n_p), y, jnp.asarray(n_o)]


# ----------------------------------------------------------------------------
# Deterministic parameter construction (synthetic; no checkpoint load)
# ----------------------------------------------------------------------------
def make_params(key, c_in_eff, c_out, eps=1e-5):
    k1, k2, k3, k4, k5 = jax.random.split(key, 5)
    w = jax.random.normal(k1, (c_in_eff, c_out), jnp.float32) * (1.0 / np.sqrt(c_in_eff))
    gamma = 1.0 + 0.1 * jax.random.normal(k2, (1, c_out), jnp.float32)
    beta = 0.1 * jax.random.normal(k3, (1, c_out), jnp.float32)
    rmean = 0.05 * jax.random.normal(k4, (1, c_out), jnp.float32)
    rvar = 1.0 + jnp.abs(0.1 * jax.random.normal(k5, (1, c_out), jnp.float32))
    scale = gamma / jnp.sqrt(rvar + eps)
    shift = beta - rmean * scale
    return {"w": w, "scale": scale, "shift": shift}


# ----------------------------------------------------------------------------
if __name__ == "__main__":
    key = jax.random.PRNGKey(0)
    kp, kx, kw1, kw2 = jax.random.split(key, 4)

    in_planes, out_planes = 16, 32
    stride, nsample = 4, 8

    # two "batches" packed as one point set with offsets o = [48, 96]
    N = 96
    p = jax.random.normal(kp, (N, 3), jnp.float32)
    x = jax.random.normal(kx, (N, in_planes), jnp.float32)
    o = jnp.array([48, 96], dtype=jnp.int32)

    # --- stride != 1 branch (FPS + group + fused linear/BN/ReLU/maxpool kernel) ---
    params_down = make_params(kw1, 3 + in_planes, out_planes)
    n_p, y_down, n_o = transition_down_forward(p, x, o, params_down, stride, nsample)
    jax.block_until_ready(y_down)
    assert y_down.shape == (int(n_o[-1]), out_planes)
    assert bool(jnp.isfinite(y_down.astype(jnp.float32)).all())
    assert bool((y_down >= 0.0).all())  # post-ReLU max-pool must be non-negative

    # numpy reference in the literal torch order: maxpool(relu(bn(linear(xg))))
    k_real = 3 + in_planes
    k_pad = _round_up(k_real, 16)
    _, _, xg_ref = _host_sample_and_group(
        np.asarray(p), np.asarray(x), np.asarray(o).astype(np.int64), stride, nsample, k_pad)
    z = np.einsum("smk,kc->smc", xg_ref[:, :, :k_real], np.asarray(params_down["w"]))
    y_ref = np.maximum(
        z * np.asarray(params_down["scale"]) + np.asarray(params_down["shift"]), 0.0
    ).max(axis=0)
    np.testing.assert_allclose(
        np.asarray(y_down.astype(jnp.float32)), y_ref, rtol=1e-1, atol=1e-1)

    # --- stride == 1 branch (fused linear/BN/ReLU kernel) vs f32 reference ---
    params_same = make_params(kw2, in_planes, out_planes)
    p1, y_same, o1 = transition_down_forward(p, x, o, params_same, 1, nsample)
    jax.block_until_ready(y_same)
    assert y_same.shape == (N, out_planes)
    ref = jnp.maximum(
        jnp.dot(x, params_same["w"]) * params_same["scale"] + params_same["shift"], 0.0)
    np.testing.assert_allclose(
        np.asarray(y_same.astype(jnp.float32)), np.asarray(ref), rtol=1e-1, atol=1e-1)

    print("KERNEL_OK")
</pallas_src>

<mosaic_0001>
module attributes {stable_mosaic.version = 11 : i64} {
  func.func @_group_linear_bn_relu_max_kernel(%arg0: i32, %arg1: memref<8x24x32xbf16, #tpu.memory_space<vmem>>, %arg2: memref<32x32xbf16, #tpu.memory_space<vmem>>, %arg3: memref<1x32xf32, #tpu.memory_space<vmem>>, %arg4: memref<24x32xbf16, #tpu.memory_space<vmem>>) attributes {dimension_semantics = [#tpu.dimension_semantics<parallel>], iteration_bounds = array<i64: 1>, scalar_prefetch = 0 : i64, scratch_operands = 0 : i64, tpu.core_type = #tpu.core_type<tc>, window_params = [{transform_indices = @transform_0, window_bounds = array<i64: 8, 24, 32>}, {pipeline_mode = #tpu.pipeline_mode<synchronous>, transform_indices = @transform_1, window_bounds = array<i64: 32, 32>}, {pipeline_mode = #tpu.pipeline_mode<synchronous>, transform_indices = @transform_2, window_bounds = array<i64: 1, 32>}, {transform_indices = @transform_3, window_bounds = array<i64: 24, 32>}]} {
    %c0 = arith.constant 0 : index
    %c0_0 = arith.constant 0 : index
    %0 = vector.load %arg2[%c0, %c0_0] : memref<32x32xbf16, #tpu.memory_space<vmem>>, vector<32x32xbf16>
    %c0_1 = arith.constant 0 : index
    %c0_2 = arith.constant 0 : index
    %c0_3 = arith.constant 0 : index
    %1 = vector.load %arg1[%c0_1, %c0_2, %c0_3] : memref<8x24x32xbf16, #tpu.memory_space<vmem>>, vector<1x24x32xbf16>
    %2 = vector.shape_cast %1 : vector<1x24x32xbf16> to vector<24x32xbf16>
    %cst = arith.constant dense<0.000000e+00> : vector<24x32xf32>
    %3 = tpu.matmul %2, %0, %cst {dimension_numbers = #tpu.dot_dimension_numbers<[1], [0], [0], [1], [0, 0, 1, 1], [], []>} : vector<24x32xbf16>, vector<32x32xbf16>, vector<24x32xf32> -> vector<24x32xf32>
    %c1 = arith.constant 1 : index
    %c0_4 = arith.constant 0 : index
    %c0_5 = arith.constant 0 : index
    %4 = vector.load %arg1[%c1, %c0_4, %c0_5] : memref<8x24x32xbf16, #tpu.memory_space<vmem>>, vector<1x24x32xbf16>
    %5 = vector.shape_cast %4 : vector<1x24x32xbf16> to vector<24x32xbf16>
    %cst_6 = arith.constant dense<0.000000e+00> : vector<24x32xf32>
    %6 = tpu.matmul %5, %0, %cst_6 {dimension_numbers = #tpu.dot_dimension_numbers<[1], [0], [0], [1], [0, 0, 1, 1], [], []>} : vector<24x32xbf16>, vector<32x32xbf16>, vector<24x32xf32> -> vector<24x32xf32>
    %7 = arith.maximumf %3, %6 : vector<24x32xf32>
    %c2 = arith.constant 2 : index
    %c0_7 = arith.constant 0 : index
    %c0_8 = arith.constant 0 : index
    %8 = vector.load %arg1[%c2, %c0_7, %c0_8] : memref<8x24x32xbf16, #tpu.memory_space<vmem>>, vector<1x24x32xbf16>
    %9 = vector.shape_cast %8 : vector<1x24x32xbf16> to vector<24x32xbf16>
    %cst_9 = arith.constant dense<0.000000e+00> : vector<24x32xf32>
    %10 = tpu.matmul %9, %0, %cst_9 {dimension_numbers = #tpu.dot_dimension_numbers<[1], [0], [0], [1], [0, 0, 1, 1], [], []>} : vector<24x32xbf16>, vector<32x32xbf16>, vector<24x32xf32> -> vector<24x32xf32>
    %11 = arith.maximumf %7, %10 : vector<24x32xf32>
    %c3 = arith.constant 3 : index
    %c0_10 = arith.constant 0 : index
    %c0_11 = arith.constant 0 : index
    %12 = vector.load %arg1[%c3, %c0_10, %c0_11] : memref<8x24x32xbf16, #tpu.memory_space<vmem>>, vector<1x24x32xbf16>
    %13 = vector.shape_cast %12 : vector<1x24x32xbf16> to vector<24x32xbf16>
    %cst_12 = arith.constant dense<0.000000e+00> : vector<24x32xf32>
    %14 = tpu.matmul %13, %0, %cst_12 {dimension_numbers = #tpu.dot_dimension_numbers<[1], [0], [0], [1], [0, 0, 1, 1], [], []>} : vector<24x32xbf16>, vector<32x32xbf16>, vector<24x32xf32> -> vector<24x32xf32>
    %15 = arith.maximumf %11, %14 : vector<24x32xf32>
    %c4 = arith.constant 4 : index
    %c0_13 = arith.constant 0 : index
    %c0_14 = arith.constant 0 : index
    %16 = vector.load %arg1[%c4, %c0_13, %c0_14] : memref<8x24x32xbf16, #tpu.memory_space<vmem>>, vector<1x24x32xbf16>
    %17 = vector.shape_cast %16 : vector<1x24x32xbf16> to vector<24x32xbf16>
    %cst_15 = arith.constant dense<0.000000e+00> : vector<24x32xf32>
    %18 = tpu.matmul %17, %0, %cst_15 {dimension_numbers = #tpu.dot_dimension_numbers<[1], [0], [0], [1], [0, 0, 1, 1], [], []>} : vector<24x32xbf16>, vector<32x32xbf16>, vector<24x32xf32> -> vector<24x32xf32>
    %19 = arith.maximumf %15, %18 : vector<24x32xf32>
    %c5 = arith.constant 5 : index
    %c0_16 = arith.constant 0 : index
    %c0_17 = arith.constant 0 : index
    %20 = vector.load %arg1[%c5, %c0_16, %c0_17] : memref<8x24x32xbf16, #tpu.memory_space<vmem>>, vector<1x24x32xbf16>
    %21 = vector.shape_cast %20 : vector<1x24x32xbf16> to vector<24x32xbf16>
    %cst_18 = arith.constant dense<0.000000e+00> : vector<24x32xf32>
    %22 = tpu.matmul %21, %0, %cst_18 {dimension_numbers = #tpu.dot_dimension_numbers<[1], [0], [0], [1], [0, 0, 1, 1], [], []>} : vector<24x32xbf16>, vector<32x32xbf16>, vector<24x32xf32> -> vector<24x32xf32>
    %23 = arith.maximumf %19, %22 : vector<24x32xf32>
    %c6 = arith.constant 6 : index
    %c0_19 = arith.constant 0 : index
    %c0_20 = arith.constant 0 : index
    %24 = vector.load %arg1[%c6, %c0_19, %c0_20] : memref<8x24x32xbf16, #tpu.memory_space<vmem>>, vector<1x24x32xbf16>
    %25 = vector.shape_cast %24 : vector<1x24x32xbf16> to vector<24x32xbf16>
    %cst_21 = arith.constant dense<0.000000e+00> : vector<24x32xf32>
    %26 = tpu.matmul %25, %0, %cst_21 {dimension_numbers = #tpu.dot_dimension_numbers<[1], [0], [0], [1], [0, 0, 1, 1], [], []>} : vector<24x32xbf16>, vector<32x32xbf16>, vector<24x32xf32> -> vector<24x32xf32>
    %27 = arith.maximumf %23, %26 : vector<24x32xf32>
    %c7 = arith.constant 7 : index
    %c0_22 = arith.constant 0 : index
    %c0_23 = arith.constant 0 : index
    %28 = vector.load %arg1[%c7, %c0_22, %c0_23] : memref<8x24x32xbf16, #tpu.memory_space<vmem>>, vector<1x24x32xbf16>
    %29 = vector.shape_cast %28 : vector<1x24x32xbf16> to vector<24x32xbf16>
    %cst_24 = arith.constant dense<0.000000e+00> : vector<24x32xf32>
    %30 = tpu.matmul %29, %0, %cst_24 {dimension_numbers = #tpu.dot_dimension_numbers<[1], [0], [0], [1], [0, 0, 1, 1], [], []>} : vector<24x32xbf16>, vector<32x32xbf16>, vector<24x32xf32> -> vector<24x32xf32>
    %31 = arith.maximumf %27, %30 : vector<24x32xf32>
    %c0_25 = arith.constant 0 : index
    %c0_26 = arith.constant 0 : index
    %32 = vector.load %arg3[%c0_25, %c0_26] : memref<1x32xf32, #tpu.memory_space<vmem>>, vector<1x32xf32>
    %33 = vector.broadcast %32 : vector<1x32xf32> to vector<24x32xf32>
    %34 = arith.addf %31, %33 : vector<24x32xf32>
    %cst_27 = arith.constant 0.000000e+00 : f32
    %35 = vector.broadcast %cst_27 : f32 to vector<24x32xf32>
    %36 = arith.maximumf %34, %35 : vector<24x32xf32>
    %37 = arith.truncf %36 : vector<24x32xf32> to vector<24x32xbf16>
    %c0_28 = arith.constant 0 : index
    %c0_29 = arith.constant 0 : index
    %38 = vector.load %arg4[%c0_28, %c0_29] : memref<24x32xbf16, #tpu.memory_space<vmem>>, vector<24x32xbf16>
    tpu.vector_store %arg4[%c0_28, %c0_29], %37 {strides = array<i32>} : memref<24x32xbf16, #tpu.memory_space<vmem>>, vector<24x32xbf16>,
    return
  }
  func.func @transform_0(%arg0: i32) -> (i32, i32, i32) {
    %c0_i32 = arith.constant 0 : i32
    %c0_i32_0 = arith.constant 0 : i32
    %c0_i32_1 = arith.constant 0 : i32
    return %c0_i32, %arg0, %c0_i32_0 : i32, i32, i32
  }
  func.func @transform_1(%arg0: i32) -> (i32, i32) {
    %c0_i32 = arith.constant 0 : i32
    %c0_i32_0 = arith.constant 0 : i32
    %c0_i32_1 = arith.constant 0 : i32
    return %c0_i32, %c0_i32_0 : i32, i32
  }
  func.func @transform_2(%arg0: i32) -> (i32, i32) {
    %c0_i32 = arith.constant 0 : i32
    %c0_i32_0 = arith.constant 0 : i32
    %c0_i32_1 = arith.constant 0 : i32
    return %c0_i32, %c0_i32_0 : i32, i32
  }
  func.func @transform_3(%arg0: i32) -> (i32, i32) {
    %c0_i32 = arith.constant 0 : i32
    %c0_i32_0 = arith.constant 0 : i32
    return %arg0, %c0_i32 : i32, i32
  }
}

</mosaic_0001>

<bundles_post_ra>
// kernel: tpu_custom_call.1
= control target key start
LH: loop header
LB: loop body
LE: loop exit
PB: predicated region body
PF: predicated region fallthrough
CT: control target
= control target key end

     0   :  { %8 = vsyncpa [#allocation3], 0  ;;  %s625_s0 = inlined_call_operand.hbm [shape: bf16[8,24,32], index: 0, kind: input, shape index: {}]   ;;  %s626_s1 = inlined_call_operand.hbm [shape: bf16[32,32], index: 1, kind: input, shape index: {}]   ;;  %s627_s2 = inlined_call_operand.vmem [shape: f32[1,32], index: 2, kind: input, shape index: {}]   ;;  %s628_s3 = inlined_call_operand.hbm [shape: bf16[24,32], index: 3, kind: output, shape index: {}]  }
   0x1   :  { %9 = vsyncpa [#allocation6], 0 }
   0x2   :  { %10 = vsyncpa [#allocation4], 0  ;;  %s15_s14 = sshll.u32 %s625_s0, 4  ;;  %s560_s15 = smov [#allocation2]   ;;  %s16_s14 = int_to_ptr.hbm [resolvable:$true] %s15_s14 }
   0x3   :  { %s17_s16 = sshll.u32 %s560_s15, 4  ;;  %s28_s19 = sshll.u32 %s626_s1, 4  ;;  %s18_s16 = int_to_ptr.vmem [resolvable:$true] %s17_s16  ;;  %s29_s19 = int_to_ptr.hbm [resolvable:$true] %s28_s19 }
   0x4   :  { %s561_s20 = smov 64   ;;  %s562_s21 = smov 4  }
   0x5   :  { %23 = dma.hbm_to_vmem [thread:$0]  %s16_s14, 1536, %s18_s16, [#allocation3], %s561_s20, %s561_s20, %s562_s21  }
   0x6   :  { %s563_s22 = smov [#allocation5]  }
   0x7   :  { %s30_s23 = sshll.u32 %s563_s22, 4  ;;  %s31_s23 = int_to_ptr.vmem [resolvable:$true] %s30_s23 }
   0x8   :  { %36 = dma.hbm_to_vmem [thread:$0]  %s29_s19, 256, %s31_s23, [#allocation6], %s561_s20, %s561_s20, %s562_s21  }
   0x9   :  { %554 = dma.done.wait [#allocation3], 1536  }
   0xa   :  { %555 = vsyncadd [#allocation3], 4294965760 }
   0xb   :  { %556 = dma.done.wait [#allocation6], 256  }
   0xc   :  { %557 = vsyncadd [#allocation6], 4294967040  ;;  %v467_v0 = vld [vmem:[#allocation5 + $0x8] sm:$0xff]  ;;  %v466_v1 = vld [vmem:[#allocation5] sm:$0xff]  ;;  %vm75_vm0 = vcmask 261120   ;;  %vm386_vm1 = vcmask 257024  }
   0xd   :  { %88 = vmatpush.bf16.msra.mxu0 %v467_v0  ;;  %124 = vmatpush.bf16.msra.mxu1 %v467_v0  ;;  %v468_v2 = vld [vmem:[#allocation2] sm:$0xff]  ;;  %v469_v3 = vld [vmem:[#allocation2 + $0xc] sm:$0xff]  ;;  %v470_v4 = vld [vmem:[#allocation2 + $0x18] sm:$0xff]  ;;  %s396_s27 = sshll.u32 %s628_s3, 4  ;;  %s397_s27 = int_to_ptr.hbm [resolvable:$true] %s396_s27 }
   0xe   :  { %163 = vmatpush.bf16.msra.mxu2 %v467_v0  ;;  %202 = vmatpush.bf16.msra.mxu3 %v467_v0  ;;  %v471_v5 = vld [vmem:[#allocation2 + $0x24] sm:$0xff]  ;;  %v103_v7 = vld [vmem:[#allocation2 + $0x14] sm:$0xf]  ;;  %v142_v8 = vld [vmem:[#allocation2 + $0x20] sm:$0xf] }
   0xf   :  { %v54_v6 = vld [vmem:[#allocation2 + $0x8] sm:$0xf]  ;;  %v181_v9 = vld [vmem:[#allocation2 + $0x2c] sm:$0xf]  ;;  %v109_v11 = vunpack.c.l.b16 %v103_v7  ;;  %v148_v12 = vunpack.c.l.b16 %v142_v8  ;;  %v472_v18 = vld [vmem:[#allocation2 + $0x30] sm:$0xff] }
  0x10   :  { %v60_v10 = vunpack.c.l.b16 %v54_v6  ;;  %v187_v13 = vunpack.c.l.b16 %v181_v9  ;;  %v473_v19 = vld [vmem:[#allocation2 + $0x3c] sm:$0xff]  ;;  %v474_v20 = vld [vmem:[#allocation2 + $0x48] sm:$0xff]  ;;  %v475_v21 = vld [vmem:[#allocation2 + $0x54] sm:$0xff] }
  0x11   :  { %89 = vmatpush.bf16.msra.mxu0 %v466_v1  ;;  %125 = vmatpush.bf16.msra.mxu1 %v466_v1  ;;  %v111_v15 = vpack.c.b16 %v109_v11, %v109_v11  ;;  %v150_v16 = vpack.c.b16 %v148_v12, %v148_v12  ;;  %v220_v22 = vld [vmem:[#allocation2 + $0x38] sm:$0xf]  ;;  %v259_v23 = vld [vmem:[#allocation2 + $0x44] sm:$0xf]  ;;  %v298_v24 = vld [vmem:[#allocation2 + $0x50] sm:$0xf] }
  0x12   :  { %164 = vmatpush.bf16.msra.mxu2 %v466_v1  ;;  %203 = vmatpush.bf16.msra.mxu3 %v466_v1  ;;  %v62_v14 = vpack.c.b16 %v60_v10, %v60_v10  ;;  %v189_v17 = vpack.c.b16 %v187_v13, %v187_v13  ;;  %v337_v25 = vld [vmem:[#allocation2 + $0x5c] sm:$0xf]  ;;  %v226_v26 = vunpack.c.l.b16 %v220_v22  ;;  %v265_v27 = vunpack.c.l.b16 %v259_v23  ;;  %v481_v63 = vld [vmem:[%s627_s2] ss:$0 sm:$0xff]  ;;  %s564_s2 = smov [#allocation7]  }
  0x13   :  { %v304_v28 = vunpack.c.l.b16 %v298_v24  ;;  %v343_v29 = vunpack.c.l.b16 %v337_v25  ;;  %s394_s24 = sshll.u32 %s564_s2, 4  ;;  %s395_s24 = int_to_ptr.vmem [resolvable:$true] %s394_s24 }
  0x14   :  { %422 = vmatmul.msk.bf16.vlgmr.msra.gmra.mxu0 %vm75_vm0, %v468_v2  ;;  %428 = vmatmul.msk.bf16.vlgmr.msra.gmra.mxu1 %vm75_vm0, %v469_v3  ;;  %v228_v30 = vpack.c.b16 %v226_v26, %v226_v26  ;;  %v267_v31 = vpack.c.b16 %v265_v27, %v265_v27 }
  0x15   :  { %241 = vmatpush.bf16.msrb.mxu0 %v467_v0  ;;  %434 = vmatmul.msk.bf16.vlgmr.msra.gmra.mxu2 %vm75_vm0, %v470_v4  ;;  %v306_v32 = vpack.c.b16 %v304_v28, %v304_v28  ;;  %v345_v33 = vpack.c.b16 %v343_v29, %v343_v29 }
  0x16   :  { %319 = vmatpush.bf16.msrb.mxu2 %v467_v0  ;;  %440 = vmatmul.msk.bf16.vlgmr.msra.gmra.mxu3 %vm75_vm0, %v471_v5 }
  0x17   :  { %358 = vmatpush.bf16.msrb.mxu3 %v467_v0  ;;  %280 = vmatpush.bf16.msrb.mxu1 %v467_v0 }
  0x19   :  { %242 = vmatpush.bf16.msrb.mxu0 %v466_v1 }
  0x1a   :  { %320 = vmatpush.bf16.msrb.mxu2 %v466_v1 }
  0x1b   :  { %359 = vmatpush.bf16.msrb.mxu3 %v466_v1  ;;  %281 = vmatpush.bf16.msrb.mxu1 %v466_v1 }
  0x24   :  { %423 = vmatmul.msk.bf16.gmra.mxu0 %vm75_vm0, %v62_v14  ;;  %429 = vmatmul.msk.bf16.gmra.mxu1 %vm75_vm0, %v111_v15 }
  0x25   :  { %435 = vmatmul.msk.bf16.gmra.mxu2 %vm75_vm0, %v150_v16 }
  0x26   :  { %441 = vmatmul.msk.bf16.gmra.mxu3 %vm75_vm0, %v189_v17 }
  0x34   :  { %446 = vmatmul.msk.bf16.vlgmr.msrb.gmra.mxu0 %vm75_vm0, %v472_v18  ;;  %452 = vmatmul.msk.bf16.vlgmr.msrb.gmra.mxu1 %vm75_vm0, %v473_v19 }
  0x35   :  { %458 = vmatmul.msk.bf16.vlgmr.msrb.gmra.mxu2 %vm75_vm0, %v474_v20 }
  0x36   :  { %464 = vmatmul.msk.bf16.vlgmr.msrb.gmra.mxu3 %vm75_vm0, %v475_v21 }
  0x44   :  { %447 = vmatmul.msk.bf16.gmra.mxu0 %vm75_vm0, %v228_v30  ;;  %453 = vmatmul.msk.bf16.gmra.mxu1 %vm75_vm0, %v267_v31 }
  0x45   :  { %459 = vmatmul.msk.bf16.gmra.mxu2 %vm75_vm0, %v306_v32 }
  0x46   :  { %465 = vmatmul.msk.bf16.gmra.mxu3 %vm75_vm0, %v345_v33 }
  0x91   :  { %v91_v34 = vpop.f32.mrf.mxu0  ;;  %v127_v35 = vpop.f32.mrf.mxu1 }
  0x92   :  { %v136_v48 = vmax.f32 %v91_v34, %v127_v35 }
  0x98   :  { %v166_v36 = vpop.f32.mrf.mxu2 }
  0x99   :  { %v205_v37 = vpop.f32.mrf.mxu3  ;;  %v93_v38 = vpop.f32.mrf.mxu0  ;;  %v175_v49 = vmax.f32 %v136_v48, %v166_v36 }
  0x9a   :  { %v129_v39 = vpop.f32.mrf.mxu1 }
  0x9b   :  { %v214_v52 = vmax.f32 %v175_v49, %v205_v37  ;;  %v137_v55 = vmax.f32 %v93_v38, %v129_v39 }
  0xa0   :  { %v168_v40 = vpop.f32.mrf.mxu2 }
  0xa1   :  { %v207_v41 = vpop.f32.mrf.mxu3  ;;  %v96_v42 = vpop.f32.mrf.mxu0  ;;  %v176_v57 = vmax.f32 %v137_v55, %v168_v40 }
  0xa2   :  { %v132_v43 = vpop.f32.mrf.mxu1 }
  0xa3   :  { %v215_v61 = vmax.f32 %v176_v57, %v207_v41  ;;  %v138_v2 = vmax.f32 %v96_v42, %v132_v43 }
  0xa8   :  { %v171_v44 = vpop.f32.mrf.mxu2 }
  0xa9   :  { %v210_v45 = vpop.f32.mrf.mxu3  ;;  %v98_v46 = vpop.f32.mrf.mxu0  ;;  %v177_v5 = vmax.f32 %v138_v2, %v171_v44 }
  0xaa   :  { %v134_v47 = vpop.f32.mrf.mxu1 }
  0xab   :  { %v216_v11 = vmax.f32 %v177_v5, %v210_v45 }
  0xb0   :  { %v173_v50 = vpop.f32.mrf.mxu2 }
  0xb1   :  { %v212_v51 = vpop.f32.mrf.mxu3  ;;  %v244_v53 = vpop.f32.mrf.mxu0 }
  0xb2   :  { %v283_v54 = vpop.f32.mrf.mxu1  ;;  %v253_v56 = vmax.f32 %v214_v52, %v244_v53 }
  0xb4   :  { %v292_v58 = vmax.f32 %v253_v56, %v283_v54 }
  0xb8   :  { %v322_v59 = vpop.f32.mrf.mxu2 }
  0xb9   :  { %v361_v60 = vpop.f32.mrf.mxu3  ;;  %v331_v62 = vmax.f32 %v292_v58, %v322_v59  ;;  %v246_v0 = vpop.f32.mrf.mxu0 }
  0xba   :  { %v285_v1 = vpop.f32.mrf.mxu1  ;;  %v254_v4 = vmax.f32 %v215_v61, %v246_v0 }
  0xbb   :  { %v370_v3 = vmax.f32 %v331_v62, %v361_v60 }
  0xbc   :  { %v293_v8 = vmax.f32 %v254_v4, %v285_v1 }
  0xbd   :  { %v377_v6 = vadd.f32 %v481_v63, %v370_v3 }
  0xbf   :  { %v380_v7 = vmax.f32 %v377_v6, 0.0 }
  0xc0   :  { %v324_v9 = vpop.f32.mrf.mxu2 }
  0xc1   :  { %v363_v10 = vpop.f32.mrf.mxu3  ;;  %v383_v12 = vpack.c.bf16 %v380_v7, %v380_v7  ;;  %v332_v13 = vmax.f32 %v293_v8, %v324_v9  ;;  %v249_v14 = vpop.f32.mrf.mxu0 }
  0xc2   :  { %v288_v15 = vpop.f32.mrf.mxu1  ;;  %v255_v17 = vmax.f32 %v216_v11, %v249_v14 }
  0xc3   :  { %387 = vst.msk [vmem:[#allocation7] sm:$0xf] %vm386_vm1, %v383_v12  ;;  %v371_v16 = vmax.f32 %v332_v13, %v363_v10 }
  0xc4   :  { %v294_v20 = vmax.f32 %v255_v17, %v288_v15 }
  0xc5   :  { %v378_v18 = vadd.f32 %v481_v63, %v371_v16 }
  0xc7   :  { %v381_v19 = vmax.f32 %v378_v18, 0.0 }
  0xc8   :  { %v327_v21 = vpop.f32.mrf.mxu2 }
  0xc9   :  { %v366_v22 = vpop.f32.mrf.mxu3  ;;  %v384_v23 = vpack.c.bf16 %v381_v19, %v381_v19  ;;  %v333_v24 = vmax.f32 %v294_v20, %v327_v21  ;;  %v251_v25 = vpop.f32.mrf.mxu0 }
  0xca   :  { %v290_v26 = vpop.f32.mrf.mxu1 }
  0xcb   :  { %388 = vst.msk [vmem:[#allocation7 + $0x4] sm:$0xf] %vm386_vm1, %v384_v23  ;;  %v372_v27 = vmax.f32 %v333_v24, %v366_v22 }
  0xcd   :  { %v379_v28 = vadd.f32 %v481_v63, %v372_v27 }
  0xcf   :  { %v382_v29 = vmax.f32 %v379_v28, 0.0 }
  0xd0   :  { %v329_v30 = vpop.f32.mrf.mxu2 }
  0xd1   :  { %v368_v31 = vpop.f32.mrf.mxu3  ;;  %v385_v32 = vpack.c.bf16 %v382_v29, %v382_v29 }
  0xd3   :  { %389 = vst.msk [vmem:[#allocation7 + $0x8] sm:$0xf] %vm386_vm1, %v385_v32 }
  0xd4   :  { %402 = dma.vmem_to_hbm [thread:$0]  %s395_s24, 192, %s397_s27, [#allocation4], %s561_s20, %s561_s20, %s562_s21  }
  0xd5   :  { %558 = dma.done.wait [#allocation4], 192  }
  0xd6   :  { %559 = vsyncadd [#allocation4], 4294967104 }
  0xd7   :  { %407 = vsyncpa [#allocation3], 1 }
  0xd8   :  { %408 = vsyncpa [#allocation6], 1 }
  0xd9   :  { %409 = vsyncpa [#allocation4], 1 }

</bundles_post_ra>
